<compile_context>
chip_gen: v7x
topology: tpu7x:2x2x1
jax: 0.10.0
libtpu: 0.0.40
codegen_flags: <defaults>
</compile_context>

<pallas_src>
import jax
import jax.numpy as jnp
from jax.experimental import pallas as pl
from jax.experimental.pallas import tpu as pltpu


# ----------------------------------------------------------------------------- kernels

def _make_simple_kernel(reduce_axis):
    """Single HW tile: pool + fc in one straight-line body (no scratch, no pl.when)."""
    def kernel(x_ref, w_ref, b_ref, out_ref):
        pooled = jnp.max(x_ref[...], axis=reduce_axis)                    # (b_blk, C)
        logits = jnp.dot(pooled.astype(w_ref.dtype), w_ref[...],
                         preferred_element_type=jnp.float32)              # (b_blk, N_pad)
        out_ref[...] = (logits + b_ref[...]).astype(out_ref.dtype)
    return kernel


def _make_acc_kernel(reduce_axis):
    """HW tiled along the last grid axis: running max kept in f32 VMEM scratch."""
    def kernel(x_ref, w_ref, b_ref, out_ref, max_acc):
        k = pl.program_id(1)

        @pl.when(k == 0)
        def _():
            max_acc[...] = jnp.full_like(max_acc, -jnp.inf)

        tile_max = jnp.max(x_ref[...], axis=reduce_axis)                  # (b_blk, C)
        max_acc[...] = jnp.maximum(max_acc[...], tile_max.astype(max_acc.dtype))

        @pl.when(k == pl.num_programs(1) - 1)
        def _():
            pooled = max_acc[...].astype(w_ref.dtype)
            logits = jnp.dot(pooled, w_ref[...],
                             preferred_element_type=jnp.float32)
            out_ref[...] = (logits + b_ref[...]).astype(out_ref.dtype)
    return kernel


# ----------------------------------------------------------------------- tiling helpers

def _round_up(x, m):
    return ((x + m - 1) // m) * m


def _vmem_budgets():
    """Returns (vmem_limit_bytes, per-buffer x tile budget).

    v5e/v6e (128 MiB physical VMEM) -> 64 MiB scoped limit; v7x (64 MiB per TC)
    -> 48 MiB.  Per-buffer x budget = limit/3 so the double-buffered x input plus
    resident weight/bias/output/scratch stay comfortably inside the limit.
    """
    cap = None
    try:
        cap = int(pltpu.get_tpu_info().vmem_capacity_bytes)
    except Exception:
        cap = None
    if not cap or cap <= 0:
        cap = 64 * 1024 * 1024                      # conservative fallback (v7x per-core)
    limit = min(64 * 1024 * 1024, (cap * 3) // 4)
    return limit, limit // 3


def _pick_batch_block(B, min_row_bytes, budget):
    """Batch tile: up to 128, >= 2 blocks when possible (v7x megacore), budget-clamped."""
    if B <= 8:
        return B                                     # full dim (allowed by block rules)
    b = min(128, _round_up(pl.cdiv(B, 2), 8))
    while b > 8 and b * min_row_bytes > budget:
        b -= 8
    return b


def _tile_nhwc(B, C, HW, itemsize, budget):
    """x is (B, HW, C): C on lanes.  hw_blk is HW (single tile) or a multiple of 8."""
    row = C * itemsize
    b_blk = _pick_batch_block(B, min(HW, 8) * row, budget)
    per_hw = b_blk * row
    if HW * per_hw <= budget:
        return b_blk, HW                             # whole HW in one tile
    hw_blk = max(8, (budget // per_hw) // 8 * 8)
    if hw_blk >= HW:
        return b_blk, HW
    return b_blk, hw_blk


def _tile_nchw(B, C, HW, itemsize, budget):
    """x is (B, C, HW), HW % 128 == 0: hw_blk is a multiple of 128 dividing HW,
    clamped against the VMEM budget (fixes the old unbounded fallback)."""
    b_blk = _pick_batch_block(B, C * 128 * itemsize, budget)
    per_hw = b_blk * C * itemsize
    hw_blk = min(HW, max(128, (budget // per_hw) // 128 * 128))
    while HW % hw_blk != 0:
        hw_blk -= 128
    return b_blk, hw_blk


# ---------------------------------------------------------------------------- forward

def main_model_forward(x_nchw, fc_w, fc_b, *, _x_tile_budget_bytes=None):
    """MainModel.forward (pre_train=True path).

    x_nchw : (B, num_features, H, W)       backbone feature map (backbone = Identity here)
    fc_w   : (num_classes, num_features)   PyTorch nn.Linear weight layout
    fc_b   : (num_classes,)
    returns (logits (B, num_classes) float32, features (B, num_features, H, W))
    """
    B, C, H, W = x_nchw.shape
    HW = H * W
    num_classes = fc_w.shape[0]
    features = x_nchw                                 # returned unchanged
    dtype = x_nchw.dtype
    itemsize = jnp.dtype(dtype).itemsize

    vmem_limit, x_budget = _vmem_budgets()
    if _x_tile_budget_bytes is not None:              # testing hook (forces HW tiling)
        x_budget = int(_x_tile_budget_bytes)

    # Lane-dense output: pad classes up to a multiple of 128 (unmasked stores, full MXU N).
    n_pad = max(128, _round_up(num_classes, 128))
    w_t = jnp.zeros((C, n_pad), dtype).at[:, :num_classes].set(jnp.asarray(fc_w, dtype).T)
    b2 = jnp.zeros((1, n_pad), jnp.float32).at[:, :num_classes].set(
        jnp.asarray(fc_b, jnp.float32))

    use_nchw = (HW % 128 == 0)

    if use_nchw:
        # Zero-copy path: HW already lane-dense; reduce over the last (lane) axis.
        x = x_nchw.reshape(B, C, HW)
        b_blk, hw_blk = _tile_nchw(B, C, HW, itemsize, x_budget)
        n_hw = HW // hw_blk
        reduce_axis = 2
        x_block = (b_blk, C, hw_blk)
        x_map_multi = lambda i, k: (i, 0, k)
        x_map_single = lambda i: (i, 0, 0)
    else:
        # Realistic resnet-head case (HW = 16 / 49 / ...): one-time NHWC transpose so
        # num_features sits on the 128-lane axis; the pool is a dense sublane reduce.
        x = jnp.swapaxes(x_nchw.reshape(B, C, HW), 1, 2)                  # (B, HW, C)
        b_blk, hw_blk = _tile_nhwc(B, C, HW, itemsize, x_budget)
        hw_pad = HW
        if hw_blk < HW:
            hw_pad = _round_up(HW, hw_blk)
            if hw_pad > HW:                                               # -inf = max identity
                x = jnp.pad(x, ((0, 0), (0, hw_pad - HW), (0, 0)),
                            constant_values=-jnp.inf)
        n_hw = hw_pad // hw_blk
        reduce_axis = 1
        x_block = (b_blk, hw_blk, C)
        x_map_multi = lambda i, k: (i, k, 0)
        x_map_single = lambda i: (i, 0, 0)

    multi = n_hw > 1
    n_batch = pl.cdiv(B, b_blk)

    if multi:
        kernel = _make_acc_kernel(reduce_axis)
        grid = (n_batch, n_hw)
        x_map = x_map_multi
        wb_map = lambda i, k: (0, 0)
        o_map = lambda i, k: (i, 0)
        scratch = [pltpu.VMEM((b_blk, C), jnp.float32)]
        dims = ("parallel", "arbitrary")
    else:
        kernel = _make_simple_kernel(reduce_axis)
        grid = (n_batch,)
        x_map = x_map_single
        wb_map = lambda i: (0, 0)
        o_map = lambda i: (i, 0)
        scratch = []
        dims = ("parallel",)

    cost = pl.CostEstimate(
        flops=2 * B * C * n_pad,
        transcendentals=0,
        bytes_accessed=(B * HW * C * itemsize          # x read
                        + C * n_pad * itemsize         # weight read
                        + n_pad * 4                    # bias read
                        + B * n_pad * 4),              # logits write
    )

    def run(single_buffer_weights):
        wb_kwargs = {}
        if single_buffer_weights and hasattr(pl, "Buffered"):
            # Constant index map -> weight/bias stay resident; no second buffer needed.
            wb_kwargs = dict(pipeline_mode=pl.Buffered(1))
        in_specs = [
            pl.BlockSpec(x_block, x_map),
            pl.BlockSpec((C, n_pad), wb_map, **wb_kwargs),
            pl.BlockSpec((1, n_pad), wb_map, **wb_kwargs),
        ]
        out_specs = pl.BlockSpec((b_blk, n_pad), o_map)
        return pl.pallas_call(
            kernel,
            out_shape=jax.ShapeDtypeStruct((B, n_pad), jnp.float32),
            grid_spec=pltpu.PrefetchScalarGridSpec(
                num_scalar_prefetch=0,
                grid=grid,
                in_specs=in_specs,
                out_specs=out_specs,
                scratch_shapes=scratch,
            ),
            compiler_params=pltpu.CompilerParams(
                dimension_semantics=dims,
                vmem_limit_bytes=vmem_limit,
            ),
            cost_estimate=cost,
        )(x, w_t, b2)

    try:
        logits_pad = run(True)
    except Exception:
        # This jax version does not accept pipeline_mode=pl.Buffered(1) on these specs;
        # fall back to default (double) buffering — purely a small VMEM-headroom loss.
        logits_pad = run(False)

    return logits_pad[:, :num_classes], features


# ------------------------------------------------------------------------------- test

if __name__ == "__main__":
    key = jax.random.PRNGKey(0)
    ks = jax.random.split(key, 6)

    def ref_forward(x, fc_w, fc_b):
        b, c = x.shape[0], x.shape[1]
        pooled = jnp.max(x.reshape(b, c, -1), axis=-1)       # adaptive_max_pool2d(x, 1)
        return pooled @ fc_w.T + fc_b                        # fc

    def check(x, fc_w, fc_b, **kw):
        logits, feats = main_model_forward(x, fc_w, fc_b, **kw)
        logits = jax.block_until_ready(logits)
        feats = jax.block_until_ready(feats)
        assert logits.shape == (x.shape[0], fc_w.shape[0])
        assert feats.shape == x.shape
        assert jnp.allclose(logits, ref_forward(x, fc_w, fc_b), atol=1e-4, rtol=1e-4)

    num_classes = 10

    # args.base_model='resnet18' -> num_features=512; args.pre_train=True.
    # 1) resnet18-style head, tiny 4x4 feature map -> NHWC (C-on-lanes), single-tile kernel.
    x1 = jax.random.normal(ks[0], (2, 512, 4, 4), dtype=jnp.float32)
    w1 = jax.random.normal(ks[1], (num_classes, 512), dtype=jnp.float32) * 0.02
    b1 = jax.random.normal(ks[2], (num_classes,), dtype=jnp.float32) * 0.02
    check(x1, w1, b1)

    # 2) non-8-aligned HW (3x3=9) with a tiny forced budget -> NHWC, HW tiled + -inf padded,
    #    running-max accumulator kernel.
    x2 = jax.random.normal(ks[3], (2, 512, 3, 3), dtype=jnp.float32)
    check(x2, w1, b1, _x_tile_budget_bytes=16_000)

    # 3) 128-aligned HW (16x16=256) -> zero-copy NCHW path, single-tile kernel.
    x3 = jax.random.normal(ks[4], (2, 256, 16, 16), dtype=jnp.float32)
    w3 = jax.random.normal(ks[5], (num_classes, 256), dtype=jnp.float32) * 0.02
    check(x3, w3, b1)

    # 4) 128-aligned HW with a tiny forced budget -> NCHW, HW tiled, accumulator kernel.
    check(x3, w3, b1, _x_tile_budget_bytes=300_000)

    print("KERNEL_OK")
</pallas_src>

<mosaic_0001>
module attributes {stable_mosaic.version = 11 : i64} {
  func.func @kernel(%arg0: i32, %arg1: memref<2x16x512xf32, #tpu.memory_space<vmem>>, %arg2: memref<512x128xf32, #tpu.memory_space<vmem>>, %arg3: memref<1x128xf32, #tpu.memory_space<vmem>>, %arg4: memref<2x128xf32, #tpu.memory_space<vmem>>) attributes {dimension_semantics = [#tpu.dimension_semantics<parallel>], iteration_bounds = array<i64: 1>, scalar_prefetch = 0 : i64, scratch_operands = 0 : i64, tpu.core_type = #tpu.core_type<tc>, window_params = [{transform_indices = @transform_0, window_bounds = array<i64: 2, 16, 512>}, {pipeline_mode = #tpu.pipeline_mode<synchronous>, transform_indices = @transform_1, window_bounds = array<i64: 512, 128>}, {pipeline_mode = #tpu.pipeline_mode<synchronous>, transform_indices = @transform_2, window_bounds = array<i64: 1, 128>}, {transform_indices = @transform_3, window_bounds = array<i64: 2, 128>}]} {
    %c0 = arith.constant 0 : index
    %c0_0 = arith.constant 0 : index
    %c0_1 = arith.constant 0 : index
    %0 = vector.load %arg1[%c0, %c0_0, %c0_1] : memref<2x16x512xf32, #tpu.memory_space<vmem>>, vector<2x16x512xf32>
    %cst = arith.constant dense<0xFF800000> : vector<2x512xf32>
    %1 = vector.multi_reduction <maximumf>, %0, %cst [1] : vector<2x16x512xf32> to vector<2x512xf32>
    %c0_2 = arith.constant 0 : index
    %c0_3 = arith.constant 0 : index
    %2 = vector.load %arg2[%c0_2, %c0_3] : memref<512x128xf32, #tpu.memory_space<vmem>>, vector<512x128xf32>
    %cst_4 = arith.constant dense<0.000000e+00> : vector<2x128xf32>
    %3 = tpu.matmul %1, %2, %cst_4 {dimension_numbers = #tpu.dot_dimension_numbers<[1], [0], [0], [1], [0, 0, 1, 1], [], []>} : vector<2x512xf32>, vector<512x128xf32>, vector<2x128xf32> -> vector<2x128xf32>
    %c0_5 = arith.constant 0 : index
    %c0_6 = arith.constant 0 : index
    %4 = vector.load %arg3[%c0_5, %c0_6] : memref<1x128xf32, #tpu.memory_space<vmem>>, vector<1x128xf32>
    %5 = vector.broadcast %4 : vector<1x128xf32> to vector<2x128xf32>
    %6 = arith.addf %3, %5 : vector<2x128xf32>
    %c0_7 = arith.constant 0 : index
    %c0_8 = arith.constant 0 : index
    %7 = vector.load %arg4[%c0_7, %c0_8] : memref<2x128xf32, #tpu.memory_space<vmem>>, vector<2x128xf32>
    tpu.vector_store %arg4[%c0_7, %c0_8], %6 {strides = array<i32>} : memref<2x128xf32, #tpu.memory_space<vmem>>, vector<2x128xf32>,
    return
  }
  func.func @transform_0(%arg0: i32) -> (i32, i32, i32) {
    %c0_i32 = arith.constant 0 : i32
    %c0_i32_0 = arith.constant 0 : i32
    %c0_i32_1 = arith.constant 0 : i32
    return %arg0, %c0_i32, %c0_i32_0 : i32, i32, i32
  }
  func.func @transform_1(%arg0: i32) -> (i32, i32) {
    %c0_i32 = arith.constant 0 : i32
    %c0_i32_0 = arith.constant 0 : i32
    %c0_i32_1 = arith.constant 0 : i32
    return %c0_i32, %c0_i32_0 : i32, i32
  }
  func.func @transform_2(%arg0: i32) -> (i32, i32) {
    %c0_i32 = arith.constant 0 : i32
    %c0_i32_0 = arith.constant 0 : i32
    %c0_i32_1 = arith.constant 0 : i32
    return %c0_i32, %c0_i32_0 : i32, i32
  }
  func.func @transform_3(%arg0: i32) -> (i32, i32) {
    %c0_i32 = arith.constant 0 : i32
    %c0_i32_0 = arith.constant 0 : i32
    return %arg0, %c0_i32 : i32, i32
  }
}

module attributes {stable_mosaic.version = 11 : i64} {
  func.func @kernel(%arg0: i32, %arg1: memref<2x16x512xf32, #tpu.memory_space<vmem>>, %arg2: memref<512x128xf32, #tpu.memory_space<vmem>>, %arg3: memref<1x128xf32, #tpu.memory_space<vmem>>, %arg4: memref<2x128xf32, #tpu.memory_space<vmem>>) attributes {dimension_semantics = [#tpu.dimension_semantics<parallel>], iteration_bounds = array<i64: 1>, scalar_prefetch = 0 : i64, scratch_operands = 0 : i64, tpu.core_type = #tpu.core_type<tc>, window_params = [{transform_indices = @transform_0, window_bounds = array<i64: 2, 16, 512>}, {pipeline_mode = #tpu.pipeline_mode<synchronous>, transform_indices = @transform_1, window_bounds = array<i64: 512, 128>}, {pipeline_mode = #tpu.pipeline_mode<synchronous>, transform_indices = @transform_2, window_bounds = array<i64: 1, 128>}, {transform_indices = @transform_3, window_bounds = array<i64: 2, 128>}]} {
    %c0 = arith.constant 0 : index
    %c0_0 = arith.constant 0 : index
    %c0_1 = arith.constant 0 : index
    %0 = vector.load %arg1[%c0, %c0_0, %c0_1] : memref<2x16x512xf32, #tpu.memory_space<vmem>>, vector<2x16x512xf32>
    %cst = arith.constant dense<0xFF800000> : vector<2x512xf32>
    %1 = vector.multi_reduction <maximumf>, %0, %cst [1] : vector<2x16x512xf32> to vector<2x512xf32>
    %c0_2 = arith.constant 0 : index
    %c0_3 = arith.constant 0 : index
    %2 = vector.load %arg2[%c0_2, %c0_3] : memref<512x128xf32, #tpu.memory_space<vmem>>, vector<512x128xf32>
    %cst_4 = arith.constant dense<0.000000e+00> : vector<2x128xf32>
    %3 = tpu.matmul %1, %2, %cst_4 {dimension_numbers = #tpu.dot_dimension_numbers<[1], [0], [0], [1], [0, 0, 1, 1], [], []>} : vector<2x512xf32>, vector<512x128xf32>, vector<2x128xf32> -> vector<2x128xf32>
    %c0_5 = arith.constant 0 : index
    %c0_6 = arith.constant 0 : index
    %4 = vector.load %arg3[%c0_5, %c0_6] : memref<1x128xf32, #tpu.memory_space<vmem>>, vector<1x128xf32>
    %5 = vector.broadcast %4 : vector<1x128xf32> to vector<2x128xf32>
    %6 = arith.addf %3, %5 : vector<2x128xf32>
    %c0_7 = arith.constant 0 : index
    %c0_8 = arith.constant 0 : index
    %7 = vector.load %arg4[%c0_7, %c0_8] : memref<2x128xf32, #tpu.memory_space<vmem>>, vector<2x128xf32>
    tpu.vector_store %arg4[%c0_7, %c0_8], %6 {strides = array<i32>} : memref<2x128xf32, #tpu.memory_space<vmem>>, vector<2x128xf32>,
    return
  }
  func.func @transform_0(%arg0: i32) -> (i32, i32, i32) {
    %c0_i32 = arith.constant 0 : i32
    %c0_i32_0 = arith.constant 0 : i32
    %c0_i32_1 = arith.constant 0 : i32
    return %arg0, %c0_i32, %c0_i32_0 : i32, i32, i32
  }
  func.func @transform_1(%arg0: i32) -> (i32, i32) {
    %c0_i32 = arith.constant 0 : i32
    %c0_i32_0 = arith.constant 0 : i32
    %c0_i32_1 = arith.constant 0 : i32
    return %c0_i32, %c0_i32_0 : i32, i32
  }
  func.func @transform_2(%arg0: i32) -> (i32, i32) {
    %c0_i32 = arith.constant 0 : i32
    %c0_i32_0 = arith.constant 0 : i32
    %c0_i32_1 = arith.constant 0 : i32
    return %c0_i32, %c0_i32_0 : i32, i32
  }
  func.func @transform_3(%arg0: i32) -> (i32, i32) {
    %c0_i32 = arith.constant 0 : i32
    %c0_i32_0 = arith.constant 0 : i32
    return %arg0, %c0_i32 : i32, i32
  }
}

</mosaic_0001>

<bundles_post_ra>
// kernel: tpu_custom_call.1
= control target key start
LH: loop header
LB: loop body
LE: loop exit
PB: predicated region body
PF: predicated region fallthrough
CT: control target
= control target key end

     0   :  { %8 = vsyncpa [#allocation3], 0  ;;  %s671_s0 = inlined_call_operand.hbm [shape: f32[2,16,512], index: 0, kind: input, shape index: {}]   ;;  %s672_s1 = inlined_call_operand.hbm [shape: f32[512,128], index: 1, kind: input, shape index: {}]   ;;  %s673_s2 = inlined_call_operand.vmem [shape: f32[1,128], index: 2, kind: input, shape index: {}]   ;;  %s674_s3 = inlined_call_operand.hbm [shape: f32[2,128], index: 3, kind: output, shape index: {}]  }
   0x1   :  { %9 = vsyncpa [#allocation6], 0 }
   0x2   :  { %10 = vsyncpa [#allocation4], 0  ;;  %s574_s12 = smov [#allocation2]   ;;  %s502_s16 = scalar_lea.hbm %s671_s0, 2048 }
   0x3   :  { %s16_s13 = sshll.u32 %s574_s12, 4  ;;  %p503_p0 = scmp.ne.s32.totalorder %s671_s0, %s502_s16  ;;  %s17_s13 = int_to_ptr.vmem [resolvable:$true] %s16_s13 }
   0x4   :  { %p506_p1 = scmp.lt.u32.totalorder %s502_s16, %s671_s0 }
   0x6   :  { %p508_p2 = pnand %p506_p1, %p503_p0 }
   0x8   :  { %511 = shalt.err (!%p508_p2)
}
   0x9   :  { %s512_s21 = scalar_lea.vmem %s17_s13, 2048  ;;  %p517_p4 = scmp.lt.s32.totalorder %s17_s13, %s17_s13 }
   0xa   :  { %p513_p3 = scmp.ne.s32.totalorder %s17_s13, %s512_s21  ;;  %p518_p5 = scmp.lt.s32.totalorder %s512_s21, %s512_s21 }
   0xc   :  { %p519_p6 = por %p518_p5, %p517_p4 }
   0xe   :  { %p520_p7 = pnand %p519_p6, %p513_p3 }
  0x10   :  { %523 = shalt.err (!%p520_p7)
}
  0x11   :  { %s575_s22 = smov 512   ;;  %s576_s23 = smov 32  }
  0x12   :  { %22 = dma.hbm_to_vmem [thread:$0]  %s671_s0, 2048, %s17_s13, [#allocation3], %s575_s22, %s575_s22, %s576_s23  }
  0x13   :  { %s577_s26 = smov [#allocation5]   ;;  %s524_s30 = scalar_lea.hbm %s672_s1, 8192 }
  0x14   :  { %s28_s27 = sshll.u32 %s577_s26, 4  ;;  %p525_p8 = scmp.ne.s32.totalorder %s672_s1, %s524_s30  ;;  %s29_s27 = int_to_ptr.vmem [resolvable:$true] %s28_s27 }
  0x15   :  { %p528_p9 = scmp.lt.u32.totalorder %s524_s30, %s672_s1 }
  0x17   :  { %p530_p10 = pnand %p528_p9, %p525_p8 }
  0x19   :  { %533 = shalt.err (!%p530_p10)
}
  0x1a   :  { %s534_s8 = scalar_lea.vmem %s29_s27, 8192  ;;  %p539_p12 = scmp.lt.s32.totalorder %s29_s27, %s29_s27 }
  0x1b   :  { %p535_p11 = scmp.ne.s32.totalorder %s29_s27, %s534_s8  ;;  %p540_p13 = scmp.lt.s32.totalorder %s534_s8, %s534_s8 }
  0x1d   :  { %p541_p0 = por %p540_p13, %p539_p12 }
  0x1f   :  { %p542_p1 = pnand %p541_p0, %p535_p11 }
  0x21   :  { %545 = shalt.err (!%p542_p1)
}
  0x22   :  { %s578_s0 = smov 128   ;;  %s579_s9 = smov 8  }
  0x23   :  { %34 = dma.hbm_to_vmem [thread:$0]  %s672_s1, 8192, %s29_s27, [#allocation6], %s578_s0, %s578_s0, %s579_s9  }
  0x24   :  { %568 = dma.done.wait [#allocation3], 2048  }
  0x25   :  { %569 = vsyncadd [#allocation3], 4294965248 }
  0x26   :  { %570 = dma.done.wait [#allocation6], 8192  }
  0x27   :  { %571 = vsyncadd [#allocation6], 4294959104  ;;  %v131_v0 = vld [vmem:[#allocation5 + $0x80] sm:$0xff]  ;;  %v132_v1 = vld [vmem:[#allocation5 + $0x88] sm:$0xff]  ;;  %vm194_vm0 = vcmask 1041409   ;;  %s580_s13 = smov [#allocation7]  }
  0x28   :  { %v115_v2 = vld [vmem:[#allocation5] sm:$0xff]  ;;  %v431_v3 = vpack.c.bf16 %v132_v1, %v131_v0  ;;  %v116_v4 = vld [vmem:[#allocation5 + $0x8] sm:$0xff]  ;;  %v133_v11 = vld [vmem:[#allocation5 + $0x90] sm:$0xff]  ;;  %s350_s14 = sshll.u32 %s580_s13, 4  ;;  %s351_s14 = int_to_ptr.vmem [resolvable:$true] %s350_s14 }
  0x29   :  { %v163_v5 = vld [vmem:[#allocation5 + $0x180] sm:$0xff]  ;;  %v164_v6 = vld [vmem:[#allocation5 + $0x188] sm:$0xff]  ;;  %v433_v7 = vpack.c.bf16 %v116_v4, %v115_v2  ;;  %v134_v13 = vld [vmem:[#allocation5 + $0x98] sm:$0xff]  ;;  %s546_s15 = scalar_lea.vmem %s351_s14, 32  ;;  %p551_p3 = scmp.lt.s32.totalorder %s351_s14, %s351_s14 }
  0x2a   :  { %v463_v8 = vpack.c.bf16 %v164_v6, %v163_v5  ;;  %v147_v9 = vld [vmem:[#allocation5 + $0x100] sm:$0xff]  ;;  %v148_v10 = vld [vmem:[#allocation5 + $0x108] sm:$0xff]  ;;  %432 = vmatprep.subr.bf16.mxu0 %v431_v3  ;;  %v117_v14 = vld [vmem:[#allocation5 + $0x10] sm:$0xff]  ;;  %v435_v16 = vpack.c.bf16 %v134_v13, %v133_v11  ;;  %p547_p2 = scmp.ne.s32.totalorder %s351_s14, %s546_s15  ;;  %p552_p4 = scmp.lt.s32.totalorder %s546_s15, %s546_s15 }
  0x2b   :  { %v465_v12 = vpack.c.bf16 %v148_v10, %v147_v9  ;;  %v118_v15 = vld [vmem:[#allocation5 + $0x18] sm:$0xff]  ;;  %434 = vmatpush3.bf16.msra.mxu0 %v433_v7  ;;  %v165_v18 = vld [vmem:[#allocation5 + $0x190] sm:$0xff]  ;;  %v135_v23 = vld [vmem:[#allocation5 + $0xa0] sm:$0xff] }
  0x2c   :  { %464 = vmatprep.subr.bf16.mxu1 %v463_v8  ;;  %v437_v17 = vpack.c.bf16 %v118_v15, %v117_v14  ;;  %v166_v19 = vld [vmem:[#allocation5 + $0x198] sm:$0xff]  ;;  %v149_v20 = vld [vmem:[#allocation5 + $0x110] sm:$0xff]  ;;  %v136_v24 = vld [vmem:[#allocation5 + $0xa8] sm:$0xff]  ;;  %436 = vmatprep.subr.bf16.mxu0 %v435_v16  ;;  %p553_p5 = por %p552_p4, %p551_p3 }
  0x2d   :  { %466 = vmatpush3.bf16.msra.mxu1 %v465_v12  ;;  %v467_v21 = vpack.c.bf16 %v166_v19, %v165_v18  ;;  %v150_v22 = vld [vmem:[#allocation5 + $0x118] sm:$0xff]  ;;  %v439_v26 = vpack.c.bf16 %v136_v24, %v135_v23  ;;  %v119_v27 = vld [vmem:[#allocation5 + $0x20] sm:$0xff]  ;;  %v120_v28 = vld [vmem:[#allocation5 + $0x28] sm:$0xff] }
  0x2e   :  { %v469_v25 = vpack.c.bf16 %v150_v22, %v149_v20  ;;  %v167_v29 = vld [vmem:[#allocation5 + $0x1a0] sm:$0xff]  ;;  %v168_v30 = vld [vmem:[#allocation5 + $0x1a8] sm:$0xff]  ;;  %v441_v33 = vpack.c.bf16 %v120_v28, %v119_v27  ;;  %v137_v35 = vld [vmem:[#allocation5 + $0xb0] sm:$0xff]  ;;  %p554_p6 = pnand %p553_p5, %p547_p2 }
  0x2f   :  { %468 = vmatprep.subr.bf16.mxu1 %v467_v21  ;;  %v151_v31 = vld [vmem:[#allocation5 + $0x120] sm:$0xff]  ;;  %v152_v32 = vld [vmem:[#allocation5 + $0x128] sm:$0xff]  ;;  %438 = vmatpush3.bf16.msra.mxu0 %v437_v17  ;;  %v471_v34 = vpack.c.bf16 %v168_v30, %v167_v29  ;;  %v138_v36 = vld [vmem:[#allocation5 + $0xb8] sm:$0xff] }
  0x30   :  { %v121_v37 = vld [vmem:[#allocation5 + $0x30] sm:$0xff]  ;;  %440 = vmatprep.subr.bf16.mxu0 %v439_v26  ;;  %v473_v38 = vpack.c.bf16 %v152_v32, %v151_v31  ;;  %v443_v39 = vpack.c.bf16 %v138_v36, %v137_v35  ;;  %v122_v40 = vld [vmem:[#allocation5 + $0x38] sm:$0xff]  ;;  %v139_v46 = vld [vmem:[#allocation5 + $0xc0] sm:$0xff] }
  0x31   :  { %470 = vmatpush3.bf16.msra.mxu1 %v469_v25  ;;  %v169_v41 = vld [vmem:[#allocation5 + $0x1b0] sm:$0xff]  ;;  %v170_v42 = vld [vmem:[#allocation5 + $0x1b8] sm:$0xff]  ;;  %v140_v47 = vld [vmem:[#allocation5 + $0xc8] sm:$0xff]  ;;  %v445_v48 = vpack.c.bf16 %v122_v40, %v121_v37 }
  0x32   :  { %472 = vmatprep.subr.bf16.mxu1 %v471_v34  ;;  %v475_v43 = vpack.c.bf16 %v170_v42, %v169_v41  ;;  %v153_v44 = vld [vmem:[#allocation5 + $0x130] sm:$0xff]  ;;  %v154_v45 = vld [vmem:[#allocation5 + $0x138] sm:$0xff]  ;;  %v171_v49 = vld [vmem:[#allocation5 + $0x1c0] sm:$0xff]  ;;  %v447_v52 = vpack.c.bf16 %v140_v47, %v139_v46 }
  0x33   :  { %442 = vmatpush3.bf16.msra.mxu0 %v441_v33  ;;  %v172_v50 = vld [vmem:[#allocation5 + $0x1c8] sm:$0xff]  ;;  %v477_v51 = vpack.c.bf16 %v154_v45, %v153_v44  ;;  %v123_v53 = vld [vmem:[#allocation5 + $0x40] sm:$0xff]  ;;  %v141_v58 = vld [vmem:[#allocation5 + $0xd0] sm:$0xff] }
  0x34   :  { %444 = vmatprep.subr.bf16.mxu0 %v443_v39  ;;  %v124_v54 = vld [vmem:[#allocation5 + $0x48] sm:$0xff]  ;;  %v155_v55 = vld [vmem:[#allocation5 + $0x140] sm:$0xff]  ;;  %v479_v56 = vpack.c.bf16 %v172_v50, %v171_v49  ;;  %v142_v59 = vld [vmem:[#allocation5 + $0xd8] sm:$0xff] }
  0x35   :  { %474 = vmatpush3.bf16.msra.mxu1 %v473_v38  ;;  %v156_v57 = vld [vmem:[#allocation5 + $0x148] sm:$0xff]  ;;  %v125_v60 = vld [vmem:[#allocation5 + $0x50] sm:$0xff]  ;;  %v126_v61 = vld [vmem:[#allocation5 + $0x58] sm:$0xff]  ;;  %v449_v0 = vpack.c.bf16 %v124_v54, %v123_v53  ;;  %v451_v5 = vpack.c.bf16 %v142_v59, %v141_v58 }
  0x36   :  { %476 = vmatprep.subr.bf16.mxu1 %v475_v43  ;;  %v173_v62 = vld [vmem:[#allocation5 + $0x1d0] sm:$0xff]  ;;  %v174_v63 = vld [vmem:[#allocation5 + $0x1d8] sm:$0xff]  ;;  %v143_v3 = vld [vmem:[#allocation5 + $0xe0] sm:$0xff]  ;;  %v481_v4 = vpack.c.bf16 %v156_v57, %v155_v55  ;;  %v453_v18 = vpack.c.bf16 %v126_v61, %v125_v60 }
  0x37   :  { %446 = vmatpush3.bf16.msra.mxu0 %v445_v48  ;;  %v157_v1 = vld [vmem:[#allocation5 + $0x150] sm:$0xff]  ;;  %v158_v2 = vld [vmem:[#allocation5 + $0x158] sm:$0xff]  ;;  %v144_v6 = vld [vmem:[#allocation5 + $0xe8] sm:$0xff]  ;;  %v483_v9 = vpack.c.bf16 %v174_v63, %v173_v62 }
  0x38   :  { %448 = vmatprep.subr.bf16.mxu0 %v447_v52  ;;  %v175_v7 = vld [vmem:[#allocation5 + $0x1e0] sm:$0xff]  ;;  %v176_v8 = vld [vmem:[#allocation5 + $0x1e8] sm:$0xff]  ;;  %v629_v14 = vld [vmem:[#allocation5 + $0xf0] sm:$0xff]  ;;  %v485_v22 = vpack.c.bf16 %v158_v2, %v157_v1  ;;  %v455_v23 = vpack.c.bf16 %v144_v6, %v143_v3 }
  0x39   :  { %478 = vmatpush3.bf16.msra.mxu1 %v477_v51  ;;  %v127_v10 = vld [vmem:[#allocation5 + $0x60] sm:$0xff]  ;;  %v128_v11 = vld [vmem:[#allocation5 + $0x68] sm:$0xff]  ;;  %v631_v15 = vld [vmem:[#allocation5 + $0xf8] sm:$0xff]  ;;  %v487_v27 = vpack.c.bf16 %v176_v8, %v175_v7 }
  0x3a   :  { %480 = vmatprep.subr.bf16.mxu1 %v479_v56  ;;  %v625_v12 = vld [vmem:[#allocation5 + $0x160] sm:$0xff]  ;;  %v627_v13 = vld [vmem:[#allocation5 + $0x168] sm:$0xff]  ;;  %v633_v16 = vld [vmem:[#allocation5 + $0x70] sm:$0xff]  ;;  %v457_v32 = vpack.c.bf16 %v128_v11, %v127_v10  ;;  %v459_v34 = vpack.c.bf16 %v631_v15, %v629_v14 }
  0x3b   :  { %v635_v17 = vld [vmem:[#allocation5 + $0x78] sm:$0xff]  ;;  %450 = vmatpush3.bf16.msra.mxu0 %v449_v0  ;;  %v637_v19 = vld [vmem:[#allocation5 + $0x1f0] sm:$0xff]  ;;  %v44_v25 = vld [vmem:[#allocation2 + $0x8] sm:$0xff]  ;;  %v489_v33 = vpack.c.bf16 %v627_v13, %v625_v12 }
  0x3c   :  { %v178_v20 = vld [vmem:[#allocation5 + $0x1f8] sm:$0xff]  ;;  %v639_v21 = vld [vmem:[#allocation5 + $0x170] sm:$0xff]  ;;  %452 = vmatprep.subr.bf16.mxu0 %v451_v5  ;;  %v48_v26 = vld [vmem:[#allocation2 + $0x28] sm:$0xff]  ;;  %v461_v39 = vpack.c.bf16 %v635_v17, %v633_v16 }
  0x3d   :  { %482 = vmatpush3.bf16.msra.mxu1 %v481_v4  ;;  %v641_v24 = vld [vmem:[#allocation5 + $0x178] sm:$0xff]  ;;  %v52_v28 = vld [vmem:[#allocation2 + $0x48] sm:$0xff]  ;;  %v66_v30 = vmax.f32 %v44_v25, %v48_v26  ;;  %v43_v31 = vld [vmem:[#allocation2] sm:$0xff]  ;;  %v491_v46 = vpack.c.bf16 %v178_v20, %v637_v19 }
  0x3e   :  { %484 = vmatprep.subr.bf16.mxu1 %v483_v9  ;;  %v56_v29 = vld [vmem:[#allocation2 + $0x68] sm:$0xff]  ;;  %v47_v36 = vld [vmem:[#allocation2 + $0x20] sm:$0xff]  ;;  %v46_v43 = vld [vmem:[#allocation2 + $0x18] sm:$0xff]  ;;  %v493_v47 = vpack.c.bf16 %v641_v24, %v639_v21 }
  0x3f   :  { %v94_v35 = vmax.f32 %v52_v28, %v56_v29  ;;  %v51_v37 = vld [vmem:[#allocation2 + $0x40] sm:$0xff]  ;;  %454 = vmatpush3.bf16.msra.mxu0 %v453_v18  ;;  %v67_v40 = vrot.slane %v66_v30, 4  ;;  %v59_v41 = vmax.f32 %v43_v31, %v47_v36  ;;  %v50_v44 = vld [vmem:[#allocation2 + $0x38] sm:$0xff]  ;;  %v45_v51 = vld [vmem:[#allocation2 + $0x10] sm:$0xff] }
  0x40   :  { %v55_v38 = vld [vmem:[#allocation2 + $0x60] sm:$0xff]  ;;  %v54_v45 = vld [vmem:[#allocation2 + $0x58] sm:$0xff]  ;;  %456 = vmatprep.subr.bf16.mxu0 %v455_v23  ;;  %v80_v50 = vmax.f32 %v46_v43, %v50_v44  ;;  %v49_v52 = vld [vmem:[#allocation2 + $0x30] sm:$0xff] }
  0x41   :  { %v87_v42 = vmax.f32 %v51_v37, %v55_v38  ;;  %486 = vmatpush3.bf16.msra.mxu1 %v485_v22  ;;  %v95_v48 = vrot.slane %v94_v35, 4  ;;  %v58_v49 = vld [vmem:[#allocation2 + $0x78] sm:$0xff]  ;;  %v68_v53 = vmax.f32 %v66_v30, %v67_v40  ;;  %v60_v54 = vrot.slane %v59_v41, 4  ;;  %v53_v57 = vld [vmem:[#allocation2 + $0x50] sm:$0xff] }
  0x42   :  { %488 = vmatprep.subr.bf16.mxu1 %v487_v27  ;;  %v108_v56 = vmax.f32 %v54_v45, %v58_v49  ;;  %v57_v58 = vld [vmem:[#allocation2 + $0x70] sm:$0xff]  ;;  %v81_v60 = vrot.slane %v80_v50, 4  ;;  %v73_v61 = vmax.f32 %v45_v51, %v49_v52  ;;  %v360_v45 = vld [vmem:[%s673_s2] ss:$0 sm:$0xff] }
  0x43   :  { %v88_v55 = vrot.slane %v87_v42, 4  ;;  %v96_v59 = vmax.f32 %v94_v35, %v95_v48  ;;  %v101_v62 = vmax.f32 %v53_v57, %v57_v58  ;;  %458 = vmatpush3.bf16.msra.mxu0 %v457_v32  ;;  %v69_v63 = vrot.slane %v68_v53, 2 }
  0x44   :  { %v61_v0 = vmax.f32 %v59_v41, %v60_v54  ;;  %v109_v2 = vrot.slane %v108_v56, 4  ;;  %460 = vmatprep.subr.bf16.mxu0 %v459_v34  ;;  %v82_v4 = vmax.f32 %v80_v50, %v81_v60  ;;  %v74_v5 = vrot.slane %v73_v61, 4 }
  0x45   :  { %v89_v1 = vmax.f32 %v87_v42, %v88_v55  ;;  %490 = vmatpush3.bf16.msra.mxu1 %v489_v33  ;;  %v97_v3 = vrot.slane %v96_v59, 2  ;;  %v102_v6 = vrot.slane %v101_v62, 4  ;;  %v70_v7 = vmax.f32 %v68_v53, %v69_v63 }
  0x46   :  { %492 = vmatprep.subr.bf16.mxu1 %v491_v46  ;;  %v62_v8 = vrot.slane %v61_v0, 2  ;;  %v110_v10 = vmax.f32 %v108_v56, %v109_v2  ;;  %v83_v12 = vrot.slane %v82_v4, 2  ;;  %v75_v13 = vmax.f32 %v73_v61, %v74_v5 }
  0x47   :  { %v90_v9 = vrot.slane %v89_v1, 2  ;;  %v98_v11 = vmax.f32 %v96_v59, %v97_v3  ;;  %v103_v14 = vmax.f32 %v101_v62, %v102_v6  ;;  %462 = vmatpush3.bf16.msra.mxu0 %v461_v39  ;;  %v71_v15 = vrot.slane %v70_v7, 1 }
  0x48   :  { %v63_v16 = vmax.f32 %v61_v0, %v62_v8  ;;  %v111_v18 = vrot.slane %v110_v10, 2  ;;  %v84_v20 = vmax.f32 %v82_v4, %v83_v12  ;;  %v76_v21 = vrot.slane %v75_v13, 2 }
  0x49   :  { %v91_v17 = vmax.f32 %v89_v1, %v90_v9  ;;  %494 = vmatpush3.bf16.msra.mxu1 %v493_v47  ;;  %v99_v19 = vrot.slane %v98_v11, 1  ;;  %v104_v22 = vrot.slane %v103_v14, 2  ;;  %v72_v23 = vmax.f32 %v70_v7, %v71_v15 }
  0x4a   :  { %v64_v24 = vrot.slane %v63_v16, 1  ;;  %v112_v26 = vmax.f32 %v110_v10, %v111_v18  ;;  %v85_v28 = vrot.slane %v84_v20, 1  ;;  %v77_v29 = vmax.f32 %v75_v13, %v76_v21 }
  0x4b   :  { %v92_v25 = vrot.slane %v91_v17, 1  ;;  %v100_v27 = vmax.f32 %v98_v11, %v99_v19  ;;  %v105_v30 = vmax.f32 %v103_v14, %v104_v22 }
  0x4c   :  { %v65_v31 = vmax.f32 %v63_v16, %v64_v24  ;;  %v113_v33 = vrot.slane %v112_v26, 1  ;;  %v86_v35 = vmax.f32 %v84_v20, %v85_v28  ;;  %v78_v36 = vrot.slane %v77_v29, 1 }
  0x4d   :  { %v93_v32 = vmax.f32 %v91_v17, %v92_v25  ;;  %v196_v34 = vsel %vm194_vm0, %v100_v27, %v72_v23  ;;  %v106_v37 = vrot.slane %v105_v30, 1 }
  0x4e   :  { %267 = vmatprep.mubr.f32.mxu0 %v196_v34  ;;  %v114_v39 = vmax.f32 %v112_v26, %v113_v33  ;;  %v79_v40 = vmax.f32 %v77_v29, %v78_v36 }
  0x4f   :  { %v195_v38 = vsel %vm194_vm0, %v93_v32, %v65_v31  ;;  %v107_v41 = vmax.f32 %v105_v30, %v106_v37 }
  0x50   :  { %268 = vmatmul.mubr.f32.vlgmr.msra.gmra.mrb[0].mxu0 %v195_v38  ;;  %v198_v42 = vsel %vm194_vm0, %v114_v39, %v86_v35 }
  0x51   :  { %337 = vmatprep.mubr.f32.mxu1 %v198_v42  ;;  %v197_v43 = vsel %vm194_vm0, %v107_v41, %v79_v40 }
  0x52   :  { %338 = vmatmul.mubr.f32.vlgmr.msra.gmra.mrb[0].mxu1 %v197_v43 }
 0x123   :  { %v393_v44 = vpop.f32.mrb[0].mxu0 }
 0x124   :  { %v394_v46 = vpop.f32.mrb[1].mxu0 }
 0x125   :  { %v395_v47 = vadd.f32 %v394_v46, %v393_v44  ;;  %v428_v48 = vpop.f32.mrb[0].mxu1 }
 0x126   :  { %v429_v50 = vpop.f32.mrb[1].mxu1 }
 0x127   :  { %v270_v49 = vadd.f32 %v395_v47, %v360_v45  ;;  %v430_v51 = vadd.f32 %v429_v50, %v428_v48 }
 0x129   :  { %v340_v52 = vadd.f32 %v430_v51, %v270_v49 }
 0x12b   :  { %343 = vst [vmem:[#allocation7] sm:$0x3] %v340_v52 }
 0x12c   :  { %557 = shalt.err (!%p554_p6)
}
 0x12d   :  { %s558_s17 = scalar_lea.hbm %s674_s3, 32 }
 0x12e   :  { %p559_p7 = scmp.ne.s32.totalorder %s674_s3, %s558_s17  ;;  %p562_p8 = scmp.lt.u32.totalorder %s558_s17, %s674_s3 }
 0x130   :  { %p564_p9 = pnand %p562_p8, %p559_p7 }
 0x132   :  { %567 = shalt.err (!%p564_p9)
}
 0x133   :  { %353 = dma.vmem_to_hbm [thread:$0]  %s351_s14, 32, %s674_s3, [#allocation4]  }
 0x134   :  { %572 = dma.done.wait [#allocation4], 32  }
 0x135   :  { %573 = vsyncadd [#allocation4], 4294967264 }
 0x136   :  { %357 = vsyncpa [#allocation3], 1 }
 0x137   :  { %358 = vsyncpa [#allocation6], 1 }
 0x138   :  { %359 = vsyncpa [#allocation4], 1 }

// kernel: tpu_custom_call.1
= control target key start
LH: loop header
LB: loop body
LE: loop exit
PB: predicated region body
PF: predicated region fallthrough
CT: control target
= control target key end

     0   :  { %8 = vsyncpa [#allocation3], 0  ;;  %s671_s0 = inlined_call_operand.hbm [shape: f32[2,16,512], index: 0, kind: input, shape index: {}]   ;;  %s672_s1 = inlined_call_operand.hbm [shape: f32[512,128], index: 1, kind: input, shape index: {}]   ;;  %s673_s2 = inlined_call_operand.vmem [shape: f32[1,128], index: 2, kind: input, shape index: {}]   ;;  %s674_s3 = inlined_call_operand.hbm [shape: f32[2,128], index: 3, kind: output, shape index: {}]  }
   0x1   :  { %9 = vsyncpa [#allocation6], 0 }
   0x2   :  { %10 = vsyncpa [#allocation4], 0  ;;  %s574_s12 = smov [#allocation2]   ;;  %s502_s16 = scalar_lea.hbm %s671_s0, 2048 }
   0x3   :  { %s16_s13 = sshll.u32 %s574_s12, 4  ;;  %p503_p0 = scmp.ne.s32.totalorder %s671_s0, %s502_s16  ;;  %s17_s13 = int_to_ptr.vmem [resolvable:$true] %s16_s13 }
   0x4   :  { %p506_p1 = scmp.lt.u32.totalorder %s502_s16, %s671_s0 }
   0x6   :  { %p508_p2 = pnand %p506_p1, %p503_p0 }
   0x8   :  { %511 = shalt.err (!%p508_p2)
}
   0x9   :  { %s512_s21 = scalar_lea.vmem %s17_s13, 2048  ;;  %p517_p4 = scmp.lt.s32.totalorder %s17_s13, %s17_s13 }
   0xa   :  { %p513_p3 = scmp.ne.s32.totalorder %s17_s13, %s512_s21  ;;  %p518_p5 = scmp.lt.s32.totalorder %s512_s21, %s512_s21 }
   0xc   :  { %p519_p6 = por %p518_p5, %p517_p4 }
   0xe   :  { %p520_p7 = pnand %p519_p6, %p513_p3 }
  0x10   :  { %523 = shalt.err (!%p520_p7)
}
  0x11   :  { %s575_s22 = smov 512   ;;  %s576_s23 = smov 32  }
  0x12   :  { %22 = dma.hbm_to_vmem [thread:$0]  %s671_s0, 2048, %s17_s13, [#allocation3], %s575_s22, %s575_s22, %s576_s23  }
  0x13   :  { %s577_s26 = smov [#allocation5]   ;;  %s524_s30 = scalar_lea.hbm %s672_s1, 8192 }
  0x14   :  { %s28_s27 = sshll.u32 %s577_s26, 4  ;;  %p525_p8 = scmp.ne.s32.totalorder %s672_s1, %s524_s30  ;;  %s29_s27 = int_to_ptr.vmem [resolvable:$true] %s28_s27 }
  0x15   :  { %p528_p9 = scmp.lt.u32.totalorder %s524_s30, %s672_s1 }
  0x17   :  { %p530_p10 = pnand %p528_p9, %p525_p8 }
  0x19   :  { %533 = shalt.err (!%p530_p10)
}
  0x1a   :  { %s534_s8 = scalar_lea.vmem %s29_s27, 8192  ;;  %p539_p12 = scmp.lt.s32.totalorder %s29_s27, %s29_s27 }
  0x1b   :  { %p535_p11 = scmp.ne.s32.totalorder %s29_s27, %s534_s8  ;;  %p540_p13 = scmp.lt.s32.totalorder %s534_s8, %s534_s8 }
  0x1d   :  { %p541_p0 = por %p540_p13, %p539_p12 }
  0x1f   :  { %p542_p1 = pnand %p541_p0, %p535_p11 }
  0x21   :  { %545 = shalt.err (!%p542_p1)
}
  0x22   :  { %s578_s0 = smov 128   ;;  %s579_s9 = smov 8  }
  0x23   :  { %34 = dma.hbm_to_vmem [thread:$0]  %s672_s1, 8192, %s29_s27, [#allocation6], %s578_s0, %s578_s0, %s579_s9  }
  0x24   :  { %568 = dma.done.wait [#allocation3], 2048  }
  0x25   :  { %569 = vsyncadd [#allocation3], 4294965248 }
  0x26   :  { %570 = dma.done.wait [#allocation6], 8192  }
  0x27   :  { %571 = vsyncadd [#allocation6], 4294959104  ;;  %v131_v0 = vld [vmem:[#allocation5 + $0x80] sm:$0xff]  ;;  %v132_v1 = vld [vmem:[#allocation5 + $0x88] sm:$0xff]  ;;  %vm194_vm0 = vcmask 1041409   ;;  %s580_s13 = smov [#allocation7]  }
  0x28   :  { %v115_v2 = vld [vmem:[#allocation5] sm:$0xff]  ;;  %v431_v3 = vpack.c.bf16 %v132_v1, %v131_v0  ;;  %v116_v4 = vld [vmem:[#allocation5 + $0x8] sm:$0xff]  ;;  %v133_v11 = vld [vmem:[#allocation5 + $0x90] sm:$0xff]  ;;  %s350_s14 = sshll.u32 %s580_s13, 4  ;;  %s351_s14 = int_to_ptr.vmem [resolvable:$true] %s350_s14 }
  0x29   :  { %v163_v5 = vld [vmem:[#allocation5 + $0x180] sm:$0xff]  ;;  %v164_v6 = vld [vmem:[#allocation5 + $0x188] sm:$0xff]  ;;  %v433_v7 = vpack.c.bf16 %v116_v4, %v115_v2  ;;  %v134_v13 = vld [vmem:[#allocation5 + $0x98] sm:$0xff]  ;;  %s546_s15 = scalar_lea.vmem %s351_s14, 32  ;;  %p551_p3 = scmp.lt.s32.totalorder %s351_s14, %s351_s14 }
  0x2a   :  { %v463_v8 = vpack.c.bf16 %v164_v6, %v163_v5  ;;  %v147_v9 = vld [vmem:[#allocation5 + $0x100] sm:$0xff]  ;;  %v148_v10 = vld [vmem:[#allocation5 + $0x108] sm:$0xff]  ;;  %432 = vmatprep.subr.bf16.mxu0 %v431_v3  ;;  %v117_v14 = vld [vmem:[#allocation5 + $0x10] sm:$0xff]  ;;  %v435_v16 = vpack.c.bf16 %v134_v13, %v133_v11  ;;  %p547_p2 = scmp.ne.s32.totalorder %s351_s14, %s546_s15  ;;  %p552_p4 = scmp.lt.s32.totalorder %s546_s15, %s546_s15 }
  0x2b   :  { %v465_v12 = vpack.c.bf16 %v148_v10, %v147_v9  ;;  %v118_v15 = vld [vmem:[#allocation5 + $0x18] sm:$0xff]  ;;  %434 = vmatpush3.bf16.msra.mxu0 %v433_v7  ;;  %v165_v18 = vld [vmem:[#allocation5 + $0x190] sm:$0xff]  ;;  %v135_v23 = vld [vmem:[#allocation5 + $0xa0] sm:$0xff] }
  0x2c   :  { %464 = vmatprep.subr.bf16.mxu1 %v463_v8  ;;  %v437_v17 = vpack.c.bf16 %v118_v15, %v117_v14  ;;  %v166_v19 = vld [vmem:[#allocation5 + $0x198] sm:$0xff]  ;;  %v149_v20 = vld [vmem:[#allocation5 + $0x110] sm:$0xff]  ;;  %v136_v24 = vld [vmem:[#allocation5 + $0xa8] sm:$0xff]  ;;  %436 = vmatprep.subr.bf16.mxu0 %v435_v16  ;;  %p553_p5 = por %p552_p4, %p551_p3 }
  0x2d   :  { %466 = vmatpush3.bf16.msra.mxu1 %v465_v12  ;;  %v467_v21 = vpack.c.bf16 %v166_v19, %v165_v18  ;;  %v150_v22 = vld [vmem:[#allocation5 + $0x118] sm:$0xff]  ;;  %v439_v26 = vpack.c.bf16 %v136_v24, %v135_v23  ;;  %v119_v27 = vld [vmem:[#allocation5 + $0x20] sm:$0xff]  ;;  %v120_v28 = vld [vmem:[#allocation5 + $0x28] sm:$0xff] }
  0x2e   :  { %v469_v25 = vpack.c.bf16 %v150_v22, %v149_v20  ;;  %v167_v29 = vld [vmem:[#allocation5 + $0x1a0] sm:$0xff]  ;;  %v168_v30 = vld [vmem:[#allocation5 + $0x1a8] sm:$0xff]  ;;  %v441_v33 = vpack.c.bf16 %v120_v28, %v119_v27  ;;  %v137_v35 = vld [vmem:[#allocation5 + $0xb0] sm:$0xff]  ;;  %p554_p6 = pnand %p553_p5, %p547_p2 }
  0x2f   :  { %468 = vmatprep.subr.bf16.mxu1 %v467_v21  ;;  %v151_v31 = vld [vmem:[#allocation5 + $0x120] sm:$0xff]  ;;  %v152_v32 = vld [vmem:[#allocation5 + $0x128] sm:$0xff]  ;;  %438 = vmatpush3.bf16.msra.mxu0 %v437_v17  ;;  %v471_v34 = vpack.c.bf16 %v168_v30, %v167_v29  ;;  %v138_v36 = vld [vmem:[#allocation5 + $0xb8] sm:$0xff] }
  0x30   :  { %v121_v37 = vld [vmem:[#allocation5 + $0x30] sm:$0xff]  ;;  %440 = vmatprep.subr.bf16.mxu0 %v439_v26  ;;  %v473_v38 = vpack.c.bf16 %v152_v32, %v151_v31  ;;  %v443_v39 = vpack.c.bf16 %v138_v36, %v137_v35  ;;  %v122_v40 = vld [vmem:[#allocation5 + $0x38] sm:$0xff]  ;;  %v139_v46 = vld [vmem:[#allocation5 + $0xc0] sm:$0xff] }
  0x31   :  { %470 = vmatpush3.bf16.msra.mxu1 %v469_v25  ;;  %v169_v41 = vld [vmem:[#allocation5 + $0x1b0] sm:$0xff]  ;;  %v170_v42 = vld [vmem:[#allocation5 + $0x1b8] sm:$0xff]  ;;  %v140_v47 = vld [vmem:[#allocation5 + $0xc8] sm:$0xff]  ;;  %v445_v48 = vpack.c.bf16 %v122_v40, %v121_v37 }
  0x32   :  { %472 = vmatprep.subr.bf16.mxu1 %v471_v34  ;;  %v475_v43 = vpack.c.bf16 %v170_v42, %v169_v41  ;;  %v153_v44 = vld [vmem:[#allocation5 + $0x130] sm:$0xff]  ;;  %v154_v45 = vld [vmem:[#allocation5 + $0x138] sm:$0xff]  ;;  %v171_v49 = vld [vmem:[#allocation5 + $0x1c0] sm:$0xff]  ;;  %v447_v52 = vpack.c.bf16 %v140_v47, %v139_v46 }
  0x33   :  { %442 = vmatpush3.bf16.msra.mxu0 %v441_v33  ;;  %v172_v50 = vld [vmem:[#allocation5 + $0x1c8] sm:$0xff]  ;;  %v477_v51 = vpack.c.bf16 %v154_v45, %v153_v44  ;;  %v123_v53 = vld [vmem:[#allocation5 + $0x40] sm:$0xff]  ;;  %v141_v58 = vld [vmem:[#allocation5 + $0xd0] sm:$0xff] }
  0x34   :  { %444 = vmatprep.subr.bf16.mxu0 %v443_v39  ;;  %v124_v54 = vld [vmem:[#allocation5 + $0x48] sm:$0xff]  ;;  %v155_v55 = vld [vmem:[#allocation5 + $0x140] sm:$0xff]  ;;  %v479_v56 = vpack.c.bf16 %v172_v50, %v171_v49  ;;  %v142_v59 = vld [vmem:[#allocation5 + $0xd8] sm:$0xff] }
  0x35   :  { %474 = vmatpush3.bf16.msra.mxu1 %v473_v38  ;;  %v156_v57 = vld [vmem:[#allocation5 + $0x148] sm:$0xff]  ;;  %v125_v60 = vld [vmem:[#allocation5 + $0x50] sm:$0xff]  ;;  %v126_v61 = vld [vmem:[#allocation5 + $0x58] sm:$0xff]  ;;  %v449_v0 = vpack.c.bf16 %v124_v54, %v123_v53  ;;  %v451_v5 = vpack.c.bf16 %v142_v59, %v141_v58 }
  0x36   :  { %476 = vmatprep.subr.bf16.mxu1 %v475_v43  ;;  %v173_v62 = vld [vmem:[#allocation5 + $0x1d0] sm:$0xff]  ;;  %v174_v63 = vld [vmem:[#allocation5 + $0x1d8] sm:$0xff]  ;;  %v143_v3 = vld [vmem:[#allocation5 + $0xe0] sm:$0xff]  ;;  %v481_v4 = vpack.c.bf16 %v156_v57, %v155_v55  ;;  %v453_v18 = vpack.c.bf16 %v126_v61, %v125_v60 }
  0x37   :  { %446 = vmatpush3.bf16.msra.mxu0 %v445_v48  ;;  %v157_v1 = vld [vmem:[#allocation5 + $0x150] sm:$0xff]  ;;  %v158_v2 = vld [vmem:[#allocation5 + $0x158] sm:$0xff]  ;;  %v144_v6 = vld [vmem:[#allocation5 + $0xe8] sm:$0xff]  ;;  %v483_v9 = vpack.c.bf16 %v174_v63, %v173_v62 }
  0x38   :  { %448 = vmatprep.subr.bf16.mxu0 %v447_v52  ;;  %v175_v7 = vld [vmem:[#allocation5 + $0x1e0] sm:$0xff]  ;;  %v176_v8 = vld [vmem:[#allocation5 + $0x1e8] sm:$0xff]  ;;  %v629_v14 = vld [vmem:[#allocation5 + $0xf0] sm:$0xff]  ;;  %v485_v22 = vpack.c.bf16 %v158_v2, %v157_v1  ;;  %v455_v23 = vpack.c.bf16 %v144_v6, %v143_v3 }
  0x39   :  { %478 = vmatpush3.bf16.msra.mxu1 %v477_v51  ;;  %v127_v10 = vld [vmem:[#allocation5 + $0x60] sm:$0xff]  ;;  %v128_v11 = vld [vmem:[#allocation5 + $0x68] sm:$0xff]  ;;  %v631_v15 = vld [vmem:[#allocation5 + $0xf8] sm:$0xff]  ;;  %v487_v27 = vpack.c.bf16 %v176_v8, %v175_v7 }
  0x3a   :  { %480 = vmatprep.subr.bf16.mxu1 %v479_v56  ;;  %v625_v12 = vld [vmem:[#allocation5 + $0x160] sm:$0xff]  ;;  %v627_v13 = vld [vmem:[#allocation5 + $0x168] sm:$0xff]  ;;  %v633_v16 = vld [vmem:[#allocation5 + $0x70] sm:$0xff]  ;;  %v457_v32 = vpack.c.bf16 %v128_v11, %v127_v10  ;;  %v459_v34 = vpack.c.bf16 %v631_v15, %v629_v14 }
  0x3b   :  { %v635_v17 = vld [vmem:[#allocation5 + $0x78] sm:$0xff]  ;;  %450 = vmatpush3.bf16.msra.mxu0 %v449_v0  ;;  %v637_v19 = vld [vmem:[#allocation5 + $0x1f0] sm:$0xff]  ;;  %v44_v25 = vld [vmem:[#allocation2 + $0x8] sm:$0xff]  ;;  %v489_v33 = vpack.c.bf16 %v627_v13, %v625_v12 }
  0x3c   :  { %v178_v20 = vld [vmem:[#allocation5 + $0x1f8] sm:$0xff]  ;;  %v639_v21 = vld [vmem:[#allocation5 + $0x170] sm:$0xff]  ;;  %452 = vmatprep.subr.bf16.mxu0 %v451_v5  ;;  %v48_v26 = vld [vmem:[#allocation2 + $0x28] sm:$0xff]  ;;  %v461_v39 = vpack.c.bf16 %v635_v17, %v633_v16 }
  0x3d   :  { %482 = vmatpush3.bf16.msra.mxu1 %v481_v4  ;;  %v641_v24 = vld [vmem:[#allocation5 + $0x178] sm:$0xff]  ;;  %v52_v28 = vld [vmem:[#allocation2 + $0x48] sm:$0xff]  ;;  %v66_v30 = vmax.f32 %v44_v25, %v48_v26  ;;  %v43_v31 = vld [vmem:[#allocation2] sm:$0xff]  ;;  %v491_v46 = vpack.c.bf16 %v178_v20, %v637_v19 }
  0x3e   :  { %484 = vmatprep.subr.bf16.mxu1 %v483_v9  ;;  %v56_v29 = vld [vmem:[#allocation2 + $0x68] sm:$0xff]  ;;  %v47_v36 = vld [vmem:[#allocation2 + $0x20] sm:$0xff]  ;;  %v46_v43 = vld [vmem:[#allocation2 + $0x18] sm:$0xff]  ;;  %v493_v47 = vpack.c.bf16 %v641_v24, %v639_v21 }
  0x3f   :  { %v94_v35 = vmax.f32 %v52_v28, %v56_v29  ;;  %v51_v37 = vld [vmem:[#allocation2 + $0x40] sm:$0xff]  ;;  %454 = vmatpush3.bf16.msra.mxu0 %v453_v18  ;;  %v67_v40 = vrot.slane %v66_v30, 4  ;;  %v59_v41 = vmax.f32 %v43_v31, %v47_v36  ;;  %v50_v44 = vld [vmem:[#allocation2 + $0x38] sm:$0xff]  ;;  %v45_v51 = vld [vmem:[#allocation2 + $0x10] sm:$0xff] }
  0x40   :  { %v55_v38 = vld [vmem:[#allocation2 + $0x60] sm:$0xff]  ;;  %v54_v45 = vld [vmem:[#allocation2 + $0x58] sm:$0xff]  ;;  %456 = vmatprep.subr.bf16.mxu0 %v455_v23  ;;  %v80_v50 = vmax.f32 %v46_v43, %v50_v44  ;;  %v49_v52 = vld [vmem:[#allocation2 + $0x30] sm:$0xff] }
  0x41   :  { %v87_v42 = vmax.f32 %v51_v37, %v55_v38  ;;  %486 = vmatpush3.bf16.msra.mxu1 %v485_v22  ;;  %v95_v48 = vrot.slane %v94_v35, 4  ;;  %v58_v49 = vld [vmem:[#allocation2 + $0x78] sm:$0xff]  ;;  %v68_v53 = vmax.f32 %v66_v30, %v67_v40  ;;  %v60_v54 = vrot.slane %v59_v41, 4  ;;  %v53_v57 = vld [vmem:[#allocation2 + $0x50] sm:$0xff] }
  0x42   :  { %488 = vmatprep.subr.bf16.mxu1 %v487_v27  ;;  %v108_v56 = vmax.f32 %v54_v45, %v58_v49  ;;  %v57_v58 = vld [vmem:[#allocation2 + $0x70] sm:$0xff]  ;;  %v81_v60 = vrot.slane %v80_v50, 4  ;;  %v73_v61 = vmax.f32 %v45_v51, %v49_v52  ;;  %v360_v45 = vld [vmem:[%s673_s2] ss:$0 sm:$0xff] }
  0x43   :  { %v88_v55 = vrot.slane %v87_v42, 4  ;;  %v96_v59 = vmax.f32 %v94_v35, %v95_v48  ;;  %v101_v62 = vmax.f32 %v53_v57, %v57_v58  ;;  %458 = vmatpush3.bf16.msra.mxu0 %v457_v32  ;;  %v69_v63 = vrot.slane %v68_v53, 2 }
  0x44   :  { %v61_v0 = vmax.f32 %v59_v41, %v60_v54  ;;  %v109_v2 = vrot.slane %v108_v56, 4  ;;  %460 = vmatprep.subr.bf16.mxu0 %v459_v34  ;;  %v82_v4 = vmax.f32 %v80_v50, %v81_v60  ;;  %v74_v5 = vrot.slane %v73_v61, 4 }
  0x45   :  { %v89_v1 = vmax.f32 %v87_v42, %v88_v55  ;;  %490 = vmatpush3.bf16.msra.mxu1 %v489_v33  ;;  %v97_v3 = vrot.slane %v96_v59, 2  ;;  %v102_v6 = vrot.slane %v101_v62, 4  ;;  %v70_v7 = vmax.f32 %v68_v53, %v69_v63 }
  0x46   :  { %492 = vmatprep.subr.bf16.mxu1 %v491_v46  ;;  %v62_v8 = vrot.slane %v61_v0, 2  ;;  %v110_v10 = vmax.f32 %v108_v56, %v109_v2  ;;  %v83_v12 = vrot.slane %v82_v4, 2  ;;  %v75_v13 = vmax.f32 %v73_v61, %v74_v5 }
  0x47   :  { %v90_v9 = vrot.slane %v89_v1, 2  ;;  %v98_v11 = vmax.f32 %v96_v59, %v97_v3  ;;  %v103_v14 = vmax.f32 %v101_v62, %v102_v6  ;;  %462 = vmatpush3.bf16.msra.mxu0 %v461_v39  ;;  %v71_v15 = vrot.slane %v70_v7, 1 }
  0x48   :  { %v63_v16 = vmax.f32 %v61_v0, %v62_v8  ;;  %v111_v18 = vrot.slane %v110_v10, 2  ;;  %v84_v20 = vmax.f32 %v82_v4, %v83_v12  ;;  %v76_v21 = vrot.slane %v75_v13, 2 }
  0x49   :  { %v91_v17 = vmax.f32 %v89_v1, %v90_v9  ;;  %494 = vmatpush3.bf16.msra.mxu1 %v493_v47  ;;  %v99_v19 = vrot.slane %v98_v11, 1  ;;  %v104_v22 = vrot.slane %v103_v14, 2  ;;  %v72_v23 = vmax.f32 %v70_v7, %v71_v15 }
  0x4a   :  { %v64_v24 = vrot.slane %v63_v16, 1  ;;  %v112_v26 = vmax.f32 %v110_v10, %v111_v18  ;;  %v85_v28 = vrot.slane %v84_v20, 1  ;;  %v77_v29 = vmax.f32 %v75_v13, %v76_v21 }
  0x4b   :  { %v92_v25 = vrot.slane %v91_v17, 1  ;;  %v100_v27 = vmax.f32 %v98_v11, %v99_v19  ;;  %v105_v30 = vmax.f32 %v103_v14, %v104_v22 }
  0x4c   :  { %v65_v31 = vmax.f32 %v63_v16, %v64_v24  ;;  %v113_v33 = vrot.slane %v112_v26, 1  ;;  %v86_v35 = vmax.f32 %v84_v20, %v85_v28  ;;  %v78_v36 = vrot.slane %v77_v29, 1 }
  0x4d   :  { %v93_v32 = vmax.f32 %v91_v17, %v92_v25  ;;  %v196_v34 = vsel %vm194_vm0, %v100_v27, %v72_v23  ;;  %v106_v37 = vrot.slane %v105_v30, 1 }
  0x4e   :  { %267 = vmatprep.mubr.f32.mxu0 %v196_v34  ;;  %v114_v39 = vmax.f32 %v112_v26, %v113_v33  ;;  %v79_v40 = vmax.f32 %v77_v29, %v78_v36 }
  0x4f   :  { %v195_v38 = vsel %vm194_vm0, %v93_v32, %v65_v31  ;;  %v107_v41 = vmax.f32 %v105_v30, %v106_v37 }
  0x50   :  { %268 = vmatmul.mubr.f32.vlgmr.msra.gmra.mrb[0].mxu0 %v195_v38  ;;  %v198_v42 = vsel %vm194_vm0, %v114_v39, %v86_v35 }
  0x51   :  { %337 = vmatprep.mubr.f32.mxu1 %v198_v42  ;;  %v197_v43 = vsel %vm194_vm0, %v107_v41, %v79_v40 }
  0x52   :  { %338 = vmatmul.mubr.f32.vlgmr.msra.gmra.mrb[0].mxu1 %v197_v43 }
 0x123   :  { %v393_v44 = vpop.f32.mrb[0].mxu0 }
 0x124   :  { %v394_v46 = vpop.f32.mrb[1].mxu0 }
 0x125   :  { %v395_v47 = vadd.f32 %v394_v46, %v393_v44  ;;  %v428_v48 = vpop.f32.mrb[0].mxu1 }
 0x126   :  { %v429_v50 = vpop.f32.mrb[1].mxu1 }
 0x127   :  { %v270_v49 = vadd.f32 %v395_v47, %v360_v45  ;;  %v430_v51 = vadd.f32 %v429_v50, %v428_v48 }
 0x129   :  { %v340_v52 = vadd.f32 %v430_v51, %v270_v49 }
 0x12b   :  { %343 = vst [vmem:[#allocation7] sm:$0x3] %v340_v52 }
 0x12c   :  { %557 = shalt.err (!%p554_p6)
}
 0x12d   :  { %s558_s17 = scalar_lea.hbm %s674_s3, 32 }
 0x12e   :  { %p559_p7 = scmp.ne.s32.totalorder %s674_s3, %s558_s17  ;;  %p562_p8 = scmp.lt.u32.totalorder %s558_s17, %s674_s3 }
 0x130   :  { %p564_p9 = pnand %p562_p8, %p559_p7 }
 0x132   :  { %567 = shalt.err (!%p564_p9)
}
 0x133   :  { %353 = dma.vmem_to_hbm [thread:$0]  %s351_s14, 32, %s674_s3, [#allocation4]  }
 0x134   :  { %572 = dma.done.wait [#allocation4], 32  }
 0x135   :  { %573 = vsyncadd [#allocation4], 4294967264 }
 0x136   :  { %357 = vsyncpa [#allocation3], 1 }
 0x137   :  { %358 = vsyncpa [#allocation6], 1 }
 0x138   :  { %359 = vsyncpa [#allocation4], 1 }

</bundles_post_ra>
